<compile_context>
chip_gen: v7x
topology: tpu7x:2x2x1
jax: 0.10.0
libtpu: 0.0.40
codegen_flags: <defaults>
</compile_context>

<pallas_src>
import jax
import jax.numpy as jnp
from jax.experimental import pallas as pl
from jax.experimental.pallas import tpu as pltpu


def _flip_cast_norm_kernel(mean_ref, inv_std_ref, x_ref, o_ref):
    # x_ref: (1, tH, W) uint8 slice of one channel plane (channel flip already applied
    # by the input index_map); o_ref: (1, tH, W) in the requested output dtype.
    c = pl.program_id(1)                       # output-channel grid coordinate
    x = x_ref[...].astype(jnp.float32)         # torch `.to(torch.float32)`
    o_ref[...] = ((x - mean_ref[c]) * inv_std_ref[c]).astype(o_ref.dtype)


_ALIGN_ROWS = 32        # uint8 packs 4 rows / sublane -> 32-row groups
_MIN_TILE_ROWS = 256    # below this, per-step overhead + short DMAs fall off roofline
_MIN_GRID_STEPS = 8     # enough grid steps for the in/compute/out pipeline to fill


def _ceil(a, b):
    return -(-a // b)


def _pick_tile_h(H, W, in_itemsize, out_itemsize, vmem_budget, n_channels):
    """Largest H-tile whose double-buffered in+out blocks fit the VMEM budget,
    shrunk (but never below ~_MIN_TILE_ROWS) so the grid has enough steps to fill
    the DMA pipeline.  Ragged trailing tiles are masked by Pallas."""
    per_row = 2 * W * (in_itemsize + out_itemsize)          # x2: double buffering
    cap = max(_ALIGN_ROWS, (vmem_budget // per_row) // _ALIGN_ROWS * _ALIGN_ROWS)
    # Pipeline-fill rule: aim for >= _MIN_GRID_STEPS total steps across the grid.
    steps_per_plane = _ceil(_MIN_GRID_STEPS, n_channels)
    steps_tile = _ceil(_ceil(H, steps_per_plane), _ALIGN_ROWS) * _ALIGN_ROWS
    tile = min(cap, steps_tile)
    # The roofline floor beats the min-steps preference, but never exceeds the cap.
    tile = max(tile, min(H, _MIN_TILE_ROWS, cap))
    if tile >= H:
        return H                                            # full-extent block: always legal
    return max(_ALIGN_ROWS, (tile // _ALIGN_ROWS) * _ALIGN_ROWS)


def _tpu_generation():
    """Best-effort TPU generation (5 / 6 / 7) from the device kind string."""
    try:
        kind = jax.devices()[0].device_kind.lower()
    except Exception:
        return None
    for gen in (7, 6, 5, 4):
        if str(gen) in kind:
            return gen
    return None


def vitae_predictor_preprocess(original_image, *, input_format="RGB",
                               data_format="CHW",
                               pixel_mean=None, pixel_std=None,
                               out_dtype=jnp.float32):
    """Pallas equivalent of ViTAEPredictor.forward preprocessing.

    Args:
      original_image: batched uint8 image, either (1, C, H, W) ("CHW", preferred hot
        path: no layout pass) or (1, H, W, C) ("HWC", module-native; one XLA transpose
        before the kernel, none after).
      input_format: 'RGB' or 'BGR' (cfg.INPUT.FORMAT). 'RGB' reverses the channels.
      pixel_mean / pixel_std: optional (C,) per-output-channel normalization fused
        into the same memory pass.  Defaults reproduce the torch forward exactly.
      out_dtype: output dtype (float32 default; pass bf16 if the backbone accepts it).

    Returns:
      (C, H, W) image in `out_dtype` (channels-first, ready for the ViT backbone).
    """
    assert input_format in ("RGB", "BGR"), input_format
    assert data_format in ("CHW", "HWC"), data_format

    img = original_image[0]                                 # glue: original_image[0]
    if data_format == "HWC":
        # Single XLA layout pass to the lane-dense CHW layout the kernel / backbone
        # want.  (Folding the HWC de-interleave into the kernel would save ~2 B/px of
        # HBM traffic; CHW is the hot path, so keep this simple and correct.)
        img = jnp.transpose(img, (2, 0, 1))
    C, H, W = img.shape

    mean = (jnp.zeros((C,), jnp.float32) if pixel_mean is None
            else jnp.asarray(pixel_mean, jnp.float32))
    inv_std = (jnp.ones((C,), jnp.float32) if pixel_std is None
               else 1.0 / jnp.asarray(pixel_std, jnp.float32))

    gen = _tpu_generation()
    # Per-generation double-buffered in+out block budget (per TensorCore):
    #   v6e: 128 MiB VMEM -> bigger tiles for very wide images (with a matching
    #        vmem_limit_bytes); v7x: 64 MiB/TC and each core holds its own buffers
    #        under CORE_PARALLEL -> keep 8 MiB; v5e: 16 MiB scoped default -> 8 MiB.
    if gen == 6:
        vmem_budget, vmem_limit = 24 * 1024 * 1024, 32 * 1024 * 1024
    else:
        vmem_budget, vmem_limit = 8 * 1024 * 1024, None

    out_itemsize = jnp.dtype(out_dtype).itemsize
    tile_h = _pick_tile_h(H, W, img.dtype.itemsize, out_itemsize, vmem_budget, C)
    num_h_tiles = pl.cdiv(H, tile_h)
    grid = (num_h_tiles, C)                                 # H-tile axis outermost

    if input_format == "RGB":
        in_map = lambda h, c: (C - 1 - c, h, 0)             # channel flip, free in the index_map
    else:
        in_map = lambda h, c: (c, h, 0)
    out_map = lambda h, c: (c, h, 0)

    def build(dim_semantics):
        params = dict(dimension_semantics=dim_semantics)
        if vmem_limit is not None:
            params["vmem_limit_bytes"] = vmem_limit
        return pl.pallas_call(
            _flip_cast_norm_kernel,
            out_shape=jax.ShapeDtypeStruct((C, H, W), out_dtype),
            grid=grid,
            in_specs=[
                pl.BlockSpec(memory_space=pltpu.MemorySpace.SMEM),   # mean   (C,)
                pl.BlockSpec(memory_space=pltpu.MemorySpace.SMEM),   # 1/std  (C,)
                pl.BlockSpec((1, tile_h, W), in_map),                # uint8 planes
            ],
            out_specs=pl.BlockSpec((1, tile_h, W), out_map),
            compiler_params=pltpu.CompilerParams(**params),
        )

    # v7x: shard the H-tile axis across the two TensorCores.  This kernel is pure HBM
    # bandwidth and plain "parallel" semantics do not engage the second core.
    if gen == 7 and num_h_tiles >= 2:
        try:
            return build((pltpu.CORE_PARALLEL, pltpu.ARBITRARY))(mean, inv_std, img)
        except Exception:   # conservative fallback if core-splitting is rejected
            pass
    return build((pltpu.PARALLEL, pltpu.ARBITRARY))(mean, inv_std, img)


if __name__ == "__main__":
    key = jax.random.PRNGKey(0)
    k1, k2 = jax.random.split(key)

    # Test 1: channels-first uint8 input, RGB format (channel flip), pure flip+cast.
    img_chw = jax.random.randint(k1, (1, 3, 64, 128), 0, 256,
                                 dtype=jnp.int32).astype(jnp.uint8)
    out1 = jax.block_until_ready(
        vitae_predictor_preprocess(img_chw, input_format="RGB"))
    ref1 = img_chw[0][::-1].astype(jnp.float32)
    assert out1.shape == ref1.shape and out1.dtype == jnp.float32
    assert bool(jnp.all(out1 == ref1))

    # Test 2: module-native HWC uint8 input, BGR format (no flip), fused mean/std.
    img_hwc = jax.random.randint(k2, (1, 48, 160, 3), 0, 256,
                                 dtype=jnp.int32).astype(jnp.uint8)
    mean = jnp.array([103.53, 116.28, 123.675], jnp.float32)
    std = jnp.array([57.375, 57.12, 58.395], jnp.float32)
    out2 = jax.block_until_ready(
        vitae_predictor_preprocess(img_hwc, input_format="BGR",
                                   data_format="HWC",
                                   pixel_mean=mean, pixel_std=std))
    ref2 = (jnp.transpose(img_hwc[0], (2, 0, 1)).astype(jnp.float32)
            - mean[:, None, None]) * (1.0 / std)[:, None, None]
    assert out2.shape == ref2.shape and out2.dtype == jnp.float32
    assert bool(jnp.allclose(out2, ref2, rtol=1e-6, atol=1e-5))

    print("KERNEL_OK")
</pallas_src>

<mosaic_0001>
module attributes {stable_mosaic.version = 11 : i64} {
  func.func @_flip_cast_norm_kernel(%arg0: i32, %arg1: i32, %arg2: memref<3xf32, #tpu.memory_space<smem>>, %arg3: memref<3xf32, #tpu.memory_space<smem>>, %arg4: memref<1x64x128xi8, #tpu.memory_space<vmem>>, %arg5: memref<1x64x128xf32, #tpu.memory_space<vmem>>) attributes {dimension_semantics = [#tpu.dimension_semantics<parallel>, #tpu.dimension_semantics<arbitrary>], iteration_bounds = array<i64: 1, 3>, scalar_prefetch = 0 : i64, scratch_operands = 0 : i64, tpu.core_type = #tpu.core_type<tc>, window_params = [{transform_indices = @transform_0, window_bounds = array<i64: 3>}, {transform_indices = @transform_1, window_bounds = array<i64: 3>}, {transform_indices = @transform_2, window_bounds = array<i64: 1, 64, 128>}, {transform_indices = @transform_3, window_bounds = array<i64: 1, 64, 128>}]} {
    %c0 = arith.constant 0 : index
    %c0_0 = arith.constant 0 : index
    %c0_1 = arith.constant 0 : index
    %0 = vector.load %arg4[%c0, %c0_0, %c0_1] : memref<1x64x128xi8, #tpu.memory_space<vmem>>, vector<1x64x128xi8>
    %1 = arith.uitofp %0 : vector<1x64x128xi8> to vector<1x64x128xf32>
    %2 = arith.index_cast %arg1 : i32 to index
    %3 = memref.load %arg2[%2] : memref<3xf32, #tpu.memory_space<smem>>
    %4 = vector.broadcast %3 : f32 to vector<1x64x128xf32>
    %5 = arith.subf %1, %4 : vector<1x64x128xf32>
    %6 = arith.index_cast %arg1 : i32 to index
    %7 = memref.load %arg3[%6] : memref<3xf32, #tpu.memory_space<smem>>
    %8 = vector.broadcast %7 : f32 to vector<1x64x128xf32>
    %9 = arith.mulf %5, %8 : vector<1x64x128xf32>
    %c0_2 = arith.constant 0 : index
    %c0_3 = arith.constant 0 : index
    %c0_4 = arith.constant 0 : index
    %10 = vector.load %arg5[%c0_2, %c0_3, %c0_4] : memref<1x64x128xf32, #tpu.memory_space<vmem>>, vector<1x64x128xf32>
    tpu.vector_store %arg5[%c0_2, %c0_3, %c0_4], %9 {strides = array<i32>} : memref<1x64x128xf32, #tpu.memory_space<vmem>>, vector<1x64x128xf32>,
    return
  }
  func.func @transform_0(%arg0: i32, %arg1: i32) -> i32 {
    %c0_i32 = arith.constant 0 : i32
    %c0_i32_0 = arith.constant 0 : i32
    return %c0_i32 : i32
  }
  func.func @transform_1(%arg0: i32, %arg1: i32) -> i32 {
    %c0_i32 = arith.constant 0 : i32
    %c0_i32_0 = arith.constant 0 : i32
    return %c0_i32 : i32
  }
  func.func @transform_2(%arg0: i32, %arg1: i32) -> (i32, i32, i32) {
    %c2_i32 = arith.constant 2 : i32
    %0 = arith.subi %c2_i32, %arg1 : i32
    %c0_i32 = arith.constant 0 : i32
    %c0_i32_0 = arith.constant 0 : i32
    return %0, %arg0, %c0_i32 : i32, i32, i32
  }
  func.func @transform_3(%arg0: i32, %arg1: i32) -> (i32, i32, i32) {
    %c0_i32 = arith.constant 0 : i32
    %c0_i32_0 = arith.constant 0 : i32
    return %arg1, %arg0, %c0_i32 : i32, i32, i32
  }
}

</mosaic_0001>

<bundles_post_ra>
// kernel: tpu_custom_call.1
= control target key start
LH: loop header
LB: loop body
LE: loop exit
PB: predicated region body
PF: predicated region fallthrough
CT: control target
= control target key end

     0   :  { %s1008_s0 = inlined_call_operand.hbm [shape: f32[3], index: 0, kind: input, shape index: {}]   ;;  %s1009_s1 = inlined_call_operand.vmem [shape: f32[3], index: 1, kind: input, shape index: {}]   ;;  %s1010_s2 = inlined_call_operand.hbm [shape: u8[3,64,128], index: 2, kind: input, shape index: {}]   ;;  %s1011_s3 = inlined_call_operand.hbm [shape: f32[3,64,128], index: 3, kind: output, shape index: {}]  }
   0x1   :  { %1018 = sst [smem:[#allocation16_spill]] %s1008_s0 }
   0x2   :  { %1019 = sst [smem:[#allocation17_spill]] %s1009_s1 }
   0x3   :  { %8 = vsyncpa [#allocation5], 0 }
   0x4   :  { %9 = vsyncpa [#allocation6], 0 }
   0x5   :  { %10 = vsyncpa [#allocation3], 0 }
   0x6   :  { %12 = vsyncpa [#allocation3 + $0x1], 0 }
   0x7   :  { %13 = vsyncpa [#allocation4], 0 }
   0x8   :  { %15 = vsyncpa [#allocation4 + $0x1], 0  ;;  %s753_s12 = smov 0   ;;  %s755_s13 = smov 0  }
   0x9   :  { %s757_s14 = smov 0   ;;  %s759_s15 = smov 0  }
   0xa   :  { %s761_s16 = smov 0   ;;  %s763_s17 = smov 0  }
   0xb   :  { %s765_s18 = smov 0   ;;  %s767_s19 = smov 0  }
   0xc   :  { %s769_s20 = smov 0  }
   0xd LB: > { %1020 = sst [smem:[#allocation14_spill]] %s691_s12  ;;  %s419_s21 = sadd.s32 4294967295, %s723_s20   ;;  %s723_s20 = sphi %s769_s20, %s21_s20   ;;  %s719_s19 = sphi %s767_s19, %s1045_s19   ;;  %s715_s18 = sphi %s765_s18, %s1044_s18   ;;  %s711_s17 = sphi %s763_s17, %s1043_s17   ;;  %s707_s16 = sphi %s761_s16, %s1042_s16   ;;  %s703_s15 = sphi %s759_s15, %s1041_s15   ;;  %s699_s14 = sphi %s757_s14, %s1040_s14   ;;  %s695_s13 = sphi %s755_s13, %s1039_s13   ;;  %s691_s12 = sphi %s753_s12, %s1038_s12  }
   0xe   : > { %s420_s22 = sadd.s32 4294967294, %s723_s20   ;;  %p93_p0 = scmp.ne.s32.totalorder %s711_s17, %s707_s16 }
   0xf   : > { %p94_p1 = scmp.eq.s32.totalorder %s723_s20, 0  ;;  %p99_p2 = scmp.ne.s32.totalorder %s707_s16, %s703_s15 }
  0x10   : > { %p802_p3 = scmp.eq.s32.totalorder %s419_s21, 0  ;;  %s114_s25 = sadd.s32 1, %s699_s14 }
  0x11   : > { %p806_p4 = por %p94_p1, %p93_p0  ;;  %p124_p6 = scmp.ne.s32.totalorder %s699_s14, %s695_s13 }
  0x12   : > { %s1021_s23 = scalar_select %p802_p3, 1, 0 }
  0x13   : > { %p813_p5 = por %p802_p3, %p99_p2  ;;  %p125_p7 = scmp.eq.s32.totalorder %s419_s21, 2 }
  0x14   : > { %p130_p8 = scmp.ne.s32.totalorder %s695_s13, %s691_s12  ;;  %p131_p9 = scmp.eq.s32.totalorder %s420_s22, 2 }
  0x15   : > { %s1023_s26 = scalar_select %p813_p5, 1, 0 }
  0x16   : > { %p421_p10 = scmp.ge.s32.totalorder %s723_s20, 1  ;;  %p822_p11 = por %p125_p7, %p124_p6 }
  0x17   : > { %p138_p12 = scmp.lt.s32.totalorder %s723_s20, 4  ;;  %p827_p13 = por %p131_p9, %p130_p8 }
  0x18   : > { %s1024_s27 = scalar_select %p822_p11, 1, 0 }
  0x19   : > { %s1025_s28 = scalar_select %p827_p13, 1, 0 }
  0x1a   : > { %p831_p0 = pnand %p421_p10, %p138_p12  ;;  %p469_p1 = scmp.lt.s32.totalorder %s723_s20, 3 }
  0x1b   : > { %1026 = sst [smem:[#allocation15_spill]] %s1025_s28  ;;  %s1028_s1 = sld [smem:[#allocation17_spill]] }
  0x1c   : > { %p452_p2 = pneg %p831_p0  ;;  %p843_p6 = pnand %p469_p1, %p806_p4 }
  0x1d   : > { %s1031_s0 = sld [smem:[#allocation16_spill]] }
  0x1e   : > { %p849_p7 = pnand %p452_p2, %p802_p3 }
  0x20   : > { %p553_p4 = pneg %p849_p7 }
  0x21   : > { %s160_s5 = sshll.u32 %s1028_s1, 4  ;;  %s161_s5 = int_to_ptr.vmem [resolvable:$true] %s160_s5 }
  0x23   : > { %s551_s10 = scalar_lea.hbm %s1031_s0, 16 }
  0x24   : > { %p552_p8 = scmp.ne.s32.totalorder %s1031_s0, %s551_s10  ;;  %p558_p12 = scmp.lt.u32.totalorder %s551_s10, %s1031_s0 }
  0x26   : > { %p554_p9 = pnand %p553_p4, %p552_p8 }
  0x28   : > { %p555_p10 = pneg %p554_p9 }
  0x2a   : > { %p560_p1 = pnand %p558_p12, %p555_p10 }
  0x2c   : > { %563 = shalt.err (!%p560_p1)
}
  0x2d   : > { %s725_s24 = smov [#allocation2]   ;;  %s564_s8 = scalar_lea.vmem %s161_s5, 16 }
  0x2e   : > { %455 = dma.hbm_to_smem (!%p849_p7), %s1031_s0, 16, %s725_s24, [#allocation5]  }
  0x2f   : > { %p565_p2 = scmp.ne.s32.totalorder %s161_s5, %s564_s8  ;;  %p572_p5 = scmp.lt.s32.totalorder %s161_s5, %s161_s5 }
  0x30   : > { %p573_p8 = scmp.lt.s32.totalorder %s564_s8, %s564_s8 }
  0x31   : > { %p567_p13 = pnand %p565_p2, %p553_p4 }
  0x32   : > { %p574_p9 = por %p573_p8, %p572_p5 }
  0x33   : > { %p568_p11 = pneg %p567_p13 }
  0x35   : > { %p575_p3 = pnand %p574_p9, %p568_p11 }
  0x37   : > { %578 = shalt.err (!%p575_p3)
}
  0x38   : > { %s726_s9 = smov [#allocation7]   ;;  %s30_s10 = sadd.s32 1, %s719_s19 }
  0x39   : > { %458 = dma.vmem_to_smem (!%p849_p7), %s161_s5, 16, %s726_s9, [#allocation6]  }
  0x3a   : > { %s79_s11 = ssub.s32 2, %s719_s19  ;;  %p31_p13 = scmp.ge.s32.totalorder %s30_s10, 3 }
  0x3b   : > { %s86_s15 = sadd.s32 1, %s711_s17  ;;  %s171_s21 = sand.u32 1, %s711_s17  }
  0x3c   : > { %s438_s22 = sshll.u32 %s79_s11, 8  ;;  %s1047_s10 = smov (%p31_p13, %s30_s10), 0 }
  0x3d   : > { %s425_s7 = sshll.u32 %s171_s21, 4  ;;  %s80_s24 = ssub.s32 2, %s1047_s10 }
  0x3e   : > { %s109_s30 = ssub.s32 %s719_s19, %s1047_s10  ;;  %s81_s4 = ssub.s32 %s79_s11, %s80_s24 }
  0x3f   : > { %p112_p3 = scmp.eq.s32.totalorder %s109_s30, 0  ;;  %p84_p5 = scmp.eq.s32.totalorder %s81_s4, 0 }
  0x40   : > { %s891_s1 = scalar_lea.hbm %s1010_s2, %s438_s22  ;;  %s175_s28 = scalar_lea.vmem [#allocation8], %s425_s7 }
  0x41   : > { %s883_s5 = scalar_select %p112_p3, %s699_s14, %s114_s25  }
  0x42   : > { %s886_s8 = scalar_select %p84_p5, %s711_s17, %s86_s15  }
  0x43   : > { %s185_s12 = sshll.u32 %s175_s28, 4  ;;  %s895_s11 = scalar_lea.sflag [#allocation3], %s171_s21  ;;  %s893_s12 = int_to_ptr.vmem [resolvable:$true] %s185_s12 }
  0x44   : > { %s579_s24 = scalar_lea.hbm %s891_s1, 256  ;;  %p581_p7 = pneg %p843_p6 }
  0x45   : > { %p580_p11 = scmp.ne.s32.totalorder %s891_s1, %s579_s24  ;;  %s584_s15 = scalar_lea.hbm %s1010_s2, 768 }
  0x46   : > { %p585_p12 = scmp.lt.u32.totalorder %s891_s1, %s1010_s2  ;;  %p586_p1 = scmp.lt.u32.totalorder %s584_s15, %s579_s24 }
  0x47   : > { %p582_p4 = pnand %p581_p7, %p580_p11  ;;  %p588_p8 = scmp.lt.u32.totalorder %s579_s24, %s891_s1 }
  0x48   : > { %p587_p2 = por %p586_p1, %p585_p12 }
  0x49   : > { %p583_p10 = pneg %p582_p4 }
  0x4a   : > { %p589_p9 = por %p588_p8, %p587_p2 }
  0x4c   : > { %p590_p13 = pnand %p589_p9, %p583_p10 }
  0x4e   : > { %593 = shalt.err (!%p590_p13)
}
  0x4f   : > { %s594_s28 = scalar_lea.vmem %s893_s12, 256  ;;  %s727_s21 = smov [#allocation8]  }
  0x50   : > { %p595_p3 = scmp.ne.s32.totalorder %s893_s12, %s594_s28  ;;  %s599_s7 = sshll.u32 %s727_s21, 4  ;;  %s600_s7 = int_to_ptr.vmem [resolvable:$false] %s599_s7 }
  0x51   : > { %s601_s4 = scalar_lea.vmem %s600_s7, 512  ;;  %p602_p4 = scmp.lt.s32.totalorder %s893_s12, %s600_s7 }
  0x52   : > { %p597_p5 = pnand %p595_p3, %p581_p7  ;;  %p603_p12 = scmp.lt.s32.totalorder %s601_s4, %s594_s28 }
  0x54   : > { %p598_p11 = pneg %p597_p5  ;;  %p604_p1 = por %p603_p12, %p602_p4 }
  0x56   : > { %p605_p2 = pnand %p604_p1, %p598_p11 }
  0x58   : > { %608 = shalt.err (!%p605_p2)
}
  0x59   : > { %s728_s9 = smov 128   ;;  %s729_s24 = smov 8  }
  0x5a   : > { %462 = dma.hbm_to_vmem [thread:$0]  (!%p843_p6), %s891_s1, 256, %s893_s12, %s895_s11, %s728_s9, %s728_s9, %s729_s24  }
  0x5b   : > { %197 = sbr.rel (%p831_p0) target bundleno = 137 (0x89), region = 32  ;;  %p1032_p7 = scmp.ne.s32.totalorder (!%p831_p0), %s1021_s23, 0 }
  0x62   : > { %674 = dma.done.wait (%p1032_p7), [#allocation5], 16  }
  0x63   : > { %676 = vsyncadd (%p1032_p7), [#allocation5], 4294967280 }
  0x64   : > { %678 = dma.done.wait (%p1032_p7), [#allocation6], 16  }
  0x65   : > { %680 = vsyncadd (%p1032_p7), [#allocation6], 4294967280  ;;  %s207_s0 = sand.u32 1, %s707_s16   ;;  %p1033_p6 = scmp.ne.s32.totalorder %s1023_s26, 0 }
  0x66   : > { %s431_s6 = sshll.u32 %s207_s0, 4  ;;  %s208_s1 = scalar_lea.sflag [#allocation3], %s207_s0 }
  0x67   : > { %s211_s12 = scalar_lea.vmem [#allocation8], %s431_s6 }
  0x68   : > { %682 = dma.done.wait (%p1033_p6), %s208_s1, 256  }
  0x69   : > { %684 = vsyncadd (%p1033_p6), %s208_s1, 4294967040 }
  0x6a   : > { %216 = sfence }
  0x6b   : > { %s232_s29 = sand.u32 1, %s695_s13   ;;  %v238_v0 = vld [vmem:[%s211_s12] sm:$0xff]  ;;  %s264_s23 = sld [smem:[#allocation2 + %s715_s18]]  ;;  %v239_v1 = vld [vmem:[%s211_s12 + $0x8] sm:$0xff] }
  0x6c   : > { %v240_v2 = vunpack.c.0.s8 %v238_v0  ;;  %s274_s11 = sld [smem:[#allocation7 + %s715_s18]]  ;;  %v241_v3 = vunpack.c.1.s8 %v238_v0  ;;  %v242_v4 = vunpack.c.2.s8 %v238_v0  ;;  %v243_v5 = vunpack.c.3.s8 %v238_v0  ;;  %s432_s26 = sshll.u32 %s232_s29, 6 }
  0x6d   : > { %v244_v6 = vunpack.c.0.s8 %v239_v1  ;;  %v245_v7 = vunpack.c.1.s8 %v239_v1  ;;  %v246_v8 = vunpack.c.2.s8 %v239_v1  ;;  %v247_v9 = vunpack.c.3.s8 %v239_v1  ;;  %s234_s25 = scalar_lea.vmem [#allocation9], %s432_s26  ;;  %s439_s22 = sshll.u32 %s715_s18, 10 }
  0x6e   : > { %v248_v10 = vand.u32 255, %v240_v2  ;;  %v249_v11 = vand.u32 255, %v241_v3  ;;  %v250_v12 = vand.u32 255, %v242_v4  ;;  %v251_v13 = vand.u32 255, %v243_v5  ;;  %s308_s15 = sshll.u32 %s234_s25, 4  ;;  %s949_s28 = scalar_lea.hbm %s1011_s3, %s439_s22  ;;  %s944_s15 = int_to_ptr.vmem [resolvable:$true] %s308_s15 }
  0x6f   : > { %v252_v14 = vand.u32 255, %v244_v6  ;;  %v253_v15 = vand.u32 255, %v245_v7  ;;  %v254_v16 = vand.u32 255, %v246_v8  ;;  %v255_v17 = vand.u32 255, %v247_v9  ;;  %s953_s21 = scalar_lea.sflag [#allocation4], %s232_s29  ;;  %s609_s7 = scalar_lea.vmem %s944_s15, 1024 }
  0x70   : > { %v256_v18 = vcvt.s32.f32 %v248_v10  ;;  %v257_v19 = vcvt.s32.f32 %v249_v11  ;;  %v258_v20 = vcvt.s32.f32 %v250_v12  ;;  %v259_v21 = vcvt.s32.f32 %v251_v13  ;;  %p610_p0 = scmp.ne.s32.totalorder %s944_s15, %s609_s7  ;;  %p1034_p10 = scmp.ne.s32.totalorder %s1024_s27, 0 }
  0x71   : > { %v265_v22 = vstv %s264_s23  ;;  %v260_v23 = vcvt.s32.f32 %v252_v14  ;;  %v261_v24 = vcvt.s32.f32 %v253_v15  ;;  %v262_v25 = vcvt.s32.f32 %v254_v16  ;;  %s730_s4 = smov [#allocation9]  }
  0x72   : > { %v266_v26 = vsub.f32 %v256_v18, %v265_v22  ;;  %v275_v27 = vstv %s274_s11  ;;  %v267_v28 = vsub.f32 %v257_v19, %v265_v22  ;;  %v268_v29 = vsub.f32 %v258_v20, %v265_v22  ;;  %p611_p8 = pnand %p610_p0, %p1034_p10  ;;  %s613_s9 = sshll.u32 %s730_s4, 4  ;;  %s614_s9 = int_to_ptr.vmem [resolvable:$false] %s613_s9 }
  0x73   : > { %v269_v30 = vsub.f32 %v259_v21, %v265_v22  ;;  %v270_v31 = vsub.f32 %v260_v23, %v265_v22  ;;  %v271_v32 = vsub.f32 %v261_v24, %v265_v22  ;;  %v272_v33 = vsub.f32 %v262_v25, %v265_v22  ;;  %s615_s24 = scalar_lea.vmem %s614_s9, 2048  ;;  %p616_p13 = scmp.lt.s32.totalorder %s944_s15, %s614_s9 }
  0x74   : > { %v276_v34 = vmul.f32 %v275_v27, %v266_v26  ;;  %v277_v35 = vmul.f32 %v275_v27, %v267_v28  ;;  %v278_v36 = vmul.f32 %v275_v27, %v268_v29  ;;  %v263_v37 = vcvt.s32.f32 %v255_v17  ;;  %p612_p9 = pneg %p611_p8  ;;  %p617_p3 = scmp.lt.s32.totalorder %s615_s24, %s609_s7 }
  0x75   : > { %v279_v38 = vmul.f32 %v275_v27, %v269_v30  ;;  %v280_v39 = vmul.f32 %v275_v27, %v270_v31  ;;  %v281_v40 = vmul.f32 %v275_v27, %v271_v32  ;;  %v282_v41 = vmul.f32 %v275_v27, %v272_v33 }
  0x76   : > { %284 = vst [vmem:[%s234_s25] sm:$0xff] %v276_v34  ;;  %285 = vst [vmem:[%s234_s25 + $0x8] sm:$0xff] %v277_v35  ;;  %v273_v42 = vsub.f32 %v263_v37, %v265_v22  ;;  %p618_p5 = por %p617_p3, %p616_p13 }
  0x77   : > { %286 = vst [vmem:[%s234_s25 + $0x10] sm:$0xff] %v278_v36  ;;  %287 = vst [vmem:[%s234_s25 + $0x18] sm:$0xff] %v279_v38 }
  0x78   : > { %288 = vst [vmem:[%s234_s25 + $0x20] sm:$0xff] %v280_v39  ;;  %289 = vst [vmem:[%s234_s25 + $0x28] sm:$0xff] %v281_v40  ;;  %v283_v43 = vmul.f32 %v275_v27, %v273_v42  ;;  %p619_p11 = pnand %p618_p5, %p612_p9 }
  0x79   : > { %290 = vst [vmem:[%s234_s25 + $0x30] sm:$0xff] %v282_v41 }
  0x7a   : > { %291 = vst [vmem:[%s234_s25 + $0x38] sm:$0xff] %v283_v43 }
  0x7b   : > { %622 = shalt.err (!%p619_p11)
}
  0x7c   : > { %s623_s0 = scalar_lea.hbm %s949_s28, 1024  ;;  %s627_s12 = scalar_lea.hbm %s1011_s3, 3072 }
  0x7d   : > { %p624_p4 = scmp.ne.s32.totalorder %s949_s28, %s623_s0  ;;  %p628_p2 = scmp.lt.u32.totalorder %s949_s28, %s1011_s3 }
  0x7e   : > { %p629_p7 = scmp.lt.u32.totalorder %s627_s12, %s623_s0  ;;  %p631_p0 = scmp.lt.u32.totalorder %s623_s0, %s949_s28 }
  0x7f   : > { %p625_p12 = pnand %p624_p4, %p1034_p10 }
  0x80   : > { %p630_p6 = por %p629_p7, %p628_p2 }
  0x81   : > { %p626_p1 = pneg %p625_p12 }
  0x82   : > { %p632_p8 = por %p631_p0, %p630_p6 }
  0x84   : > { %p633_p9 = pnand %p632_p8, %p626_p1 }
  0x86   : > { %636 = shalt.err (!%p633_p9)
}
  0x87   : > { %s731_s11 = smov 128   ;;  %s732_s26 = smov 8  }
  0x88   : > { %450 = dma.vmem_to_hbm [thread:$0]  (%p1034_p10), %s944_s15, 1024, %s949_s28, %s953_s21, %s731_s11, %s731_s11, %s732_s26  }
  0x89 PF: > { %s1035_s25 = sld [smem:[#allocation14_spill]]  ;;  %s1036_s22 = sld [smem:[#allocation15_spill]] }
  0x8a   : > { %p472_p13 = scmp.ge.s32.totalorder %s723_s20, 2 }
  0x8f   : > { %s323_s18 = sand.u32 1, %s1035_s25   ;;  %p1037_p3 = scmp.ne.s32.totalorder %s1036_s22, 0 }
  0x90   : > { %s324_s30 = scalar_lea.sflag [#allocation4], %s323_s18 }
  0x91   : > { %p464_p5 = pnand %p472_p13, %p1037_p3 }
  0x93   : > { %686 = dma.done.wait (!%p464_p5), %s324_s30, 1024  }
  0x94   : > { %688 = vsyncadd (!%p464_p5), %s324_s30, 4294966272  ;;  %s21_s20 = sadd.s32 1, %s723_s20   ;;  %s1038_s12 = smov %s695_s13 }
  0x95   : > { %p18_p11 = scmp.ge.s32.totalorder %s21_s20, 5   ;;  %s1039_s13 = smov %s699_s14 }
  0x96   : > { %s1040_s14 = smov %s883_s5  ;;  %s1041_s15 = smov %s707_s16 }
  0x97   : > { %s1042_s16 = smov %s711_s17  ;;  %s1043_s17 = smov %s886_s8 }
  0x98   : > { %s1044_s18 = smov %s719_s19  ;;  %s1045_s19 = smov %s1047_s10 }
  0x99   :  { %20 = sbr.rel (!%p18_p11) target bundleno = 13 (0xd), region = 87 }
  0xa0   :  { %329 = vsyncpa [#allocation3], 1 }
  0xa1   :  { %331 = vsyncpa [#allocation3 + $0x1], 1 }
  0xa2   :  { %332 = vsyncpa [#allocation4], 1 }
  0xa3   :  { %334 = vsyncpa [#allocation4 + $0x1], 1 }
  0xa4   :  { %335 = vsyncpa [#allocation5], 1 }
  0xa5   :  { %337 = vsyncpa [#allocation5 + $0x1], 1 }
  0xa6   :  { %338 = vsyncpa [#allocation6], 1 }
  0xa7   :  { %340 = vsyncpa [#allocation6 + $0x1], 1 }

</bundles_post_ra>
